<compile_context>
chip_gen: v5e
topology: v5e:2x2
jax: 0.10.0
libtpu: 0.0.40
codegen_flags: <defaults>
</compile_context>

<pallas_src>
import functools
import math

import jax
import jax.numpy as jnp
from jax.experimental import pallas as pl
from jax.experimental.pallas import tpu as pltpu

EPS = 1e-5  # torch.nn.LayerNorm default eps


def _round_up(x, m):
    return ((x + m - 1) // m) * m


def _round_down(x, m):
    return (x // m) * m


# --------------------------------------------------------------------------
# Kernels
# --------------------------------------------------------------------------

def _addnorm_rowwise_kernel(x_ref, y_ref, gamma_ref, beta_ref, o_ref, *, inv_h):
    """One LayerNorm row per tensor row (hidden already lane-dense, i.e. a
    multiple of 128, or the unpacked fallback).  Row sums go through the MXU
    (ones-column matmul) so the VPU/XLU only does the cheap affine math."""
    z = x_ref[...].astype(jnp.float32) + y_ref[...].astype(jnp.float32)
    ones = jnp.ones((z.shape[-1], 1), dtype=jnp.float32)
    mean = jnp.dot(z, ones, precision=jax.lax.Precision.HIGHEST,
                   preferred_element_type=jnp.float32) * inv_h
    centered = z - mean                              # reused for var and output
    var = jnp.dot(centered * centered, ones,
                  precision=jax.lax.Precision.HIGHEST,
                  preferred_element_type=jnp.float32) * inv_h
    inv = jax.lax.rsqrt(var + EPS)
    out = centered * inv * gamma_ref[...] + beta_ref[...]
    o_ref[...] = out.astype(o_ref.dtype)


def _addnorm_packed_kernel(x_ref, y_ref, gamma_ref, beta_ref, gmat_ref, o_ref,
                           *, inv_h):
    """k = 128 // hidden rows packed along the lane axis -> every vector
    load/store is lane-dense; per-row statistics recovered with a single
    block-diagonal 0/1 matmul (HIGHEST precision) on the otherwise-idle MXU."""
    z = x_ref[...].astype(jnp.float32) + y_ref[...].astype(jnp.float32)
    gmat = gmat_ref[...]
    mean = jnp.dot(z, gmat, precision=jax.lax.Precision.HIGHEST,
                   preferred_element_type=jnp.float32) * inv_h
    centered = z - mean
    var = jnp.dot(centered * centered, gmat,
                  precision=jax.lax.Precision.HIGHEST,
                  preferred_element_type=jnp.float32) * inv_h
    inv = jax.lax.rsqrt(var + EPS)
    out = centered * inv * gamma_ref[...] + beta_ref[...]
    o_ref[...] = out.astype(o_ref.dtype)


# --------------------------------------------------------------------------
# Wrapper
# --------------------------------------------------------------------------

def add_norm(x, y, gamma, beta, *,
             block_rows=None,
             target_block_bytes=2 * 1024 * 1024,   # per pipelined I/O buffer
             vmem_limit_bytes=None,                # None -> derived from chip
             min_grid_steps=2):                    # raise to ~4 on v7x (2 TCs)
    """x, y: (..., hidden); gamma, beta: (hidden,). Returns LayerNorm(x + y)."""
    assert x.shape == y.shape, "X and Y must have the same shape"
    h = x.shape[-1]
    assert gamma.shape == (h,) and beta.shape == (h,)
    lead_shape = x.shape[:-1]
    rows = math.prod(lead_shape) if lead_shape else 1

    x2 = x.reshape(rows, h)
    y2 = y.reshape(rows, h)

    # Lane packing: if hidden is a small divisor of 128, pack k rows per
    # 128-lane row so loads/stores are unmasked and lane-dense.
    # TODO(synk): hidden < 128 that does not divide 128 (e.g. 96) falls back to
    #             the row-wise masked-store path; lane-padded packing not done.
    k = 128 // h if (h < 128 and 128 % h == 0) else 1
    w = k * h                       # last dim of every block

    # Only wrapper-side copy left: pad by < k rows so the bitwise reshape to
    # (prows, w) is exact (never triggers for k == 1 or rows % k == 0).
    rows_k = _round_up(rows, k)
    if rows_k != rows:
        x2 = jnp.pad(x2, ((0, rows_k - rows), (0, 0)))
        y2 = jnp.pad(y2, ((0, rows_k - rows), (0, 0)))
    prows = rows_k // k
    xp = x2.reshape(prows, w)
    yp = y2.reshape(prows, w)

    # Sublane packing granularity for the I/O dtype (8 f32, 16 bf16, 32 int8).
    itemsize = jnp.dtype(x.dtype).itemsize
    sub = max(8, 32 // max(itemsize, 1))

    # Generation-aware VMEM budget: 64 MiB per TC on v7x, 128 MiB on v5e/v6e.
    try:
        vmem_cap = int(pltpu.get_tpu_info().vmem_capacity_bytes)
    except Exception:
        vmem_cap = 64 * 1024 * 1024            # conservative (v7x per-TC)
    if vmem_limit_bytes is None:
        vmem_limit_bytes = min(48 * 1024 * 1024, (vmem_cap * 3) // 4)

    # Per-row VMEM cost of a grid step: x/y/out double-buffered in the I/O
    # dtype (6 blocks) + ~4 f32-sized intermediates (z, centered, out, slack).
    bytes_per_row = w * (6 * itemsize + 4 * 4)
    bp_vmem = max(sub, _round_down(int(0.7 * vmem_limit_bytes) // bytes_per_row,
                                   sub))

    if block_rows is None:
        # Tile sized from the actual I/O itemsize (lane-dense full DMAs for
        # bf16/int8), but keep >= min_grid_steps steps when the problem is
        # large enough so DMA/compute pipelining has something to overlap.
        bp = max(sub, _round_down(target_block_bytes // (w * itemsize), sub))
        cap = _round_up(pl.cdiv(prows, min_grid_steps), sub)
        bp = min(bp, cap)
    else:
        bp = max(sub, _round_up(block_rows, sub))
    bp = max(sub, min(bp, bp_vmem))        # clamp (incl. user value) to budget
    bp = min(bp, prows)                    # block == full dim is always legal

    grid = (pl.cdiv(prows, bp),)           # partial final block: edge writes
                                           # are masked by Pallas, garbage rows
                                           # in the padded read region are
                                           # never observed (row-independent).
    data_spec = pl.BlockSpec((bp, w), lambda i: (i, 0))
    const_spec = pl.BlockSpec(memory_space=pltpu.MemorySpace.VMEM)

    # Constants: whole-array, non-pipelined f32 VMEM residents.
    g_row = jnp.tile(gamma.astype(jnp.float32).reshape(1, h), (1, k))
    b_row = jnp.tile(beta.astype(jnp.float32).reshape(1, h), (1, k))

    if k > 1:
        # Block-diagonal 0/1 matrix: gmat[i, j] = 1 iff lanes i and j belong to
        # the same original row inside a packed 128-lane row.
        grp = jnp.arange(w) // h
        gmat = (grp[:, None] == grp[None, :]).astype(jnp.float32)
        kernel = functools.partial(_addnorm_packed_kernel, inv_h=1.0 / h)
        operands = (xp, yp, g_row, b_row, gmat)
        in_specs = [data_spec, data_spec, const_spec, const_spec, const_spec]
    else:
        kernel = functools.partial(_addnorm_rowwise_kernel, inv_h=1.0 / h)
        operands = (xp, yp, g_row, b_row)
        in_specs = [data_spec, data_spec, const_spec, const_spec]

    out = pl.pallas_call(
        kernel,
        out_shape=jax.ShapeDtypeStruct((prows, w), x.dtype),
        grid_spec=pltpu.PrefetchScalarGridSpec(
            num_scalar_prefetch=0,
            grid=grid,
            in_specs=in_specs,
            out_specs=data_spec,
        ),
        compiler_params=pltpu.CompilerParams(
            dimension_semantics=("parallel",),
            vmem_limit_bytes=vmem_limit_bytes,
        ),
    )(*operands)

    out = out.reshape(rows_k, h)
    if rows_k != rows:
        out = out[:rows]
    return out.reshape(*lead_shape, h)


# --------------------------------------------------------------------------
# Pure-JAX reference and self-test
# --------------------------------------------------------------------------

def add_norm_ref(x, y, gamma, beta):
    z = (x + y).astype(jnp.float32)
    mean = jnp.mean(z, axis=-1, keepdims=True)
    var = jnp.mean((z - mean) ** 2, axis=-1, keepdims=True)
    out = (z - mean) * jax.lax.rsqrt(var + EPS) * gamma + beta
    return out.astype(x.dtype)


if __name__ == "__main__":
    key = jax.random.PRNGKey(0)
    k1, k2, k3, k4, k5, k6 = jax.random.split(key, 6)

    # Case 1: module-consistent small shapes (batch=2, seq=8, hidden=32)
    # -> lane-packed (hidden < 128) path, rows divisible by k.
    batch, seq, hidden = 2, 8, 32
    x = jax.random.normal(k1, (batch, seq, hidden), dtype=jnp.float32)
    y = jax.random.normal(k2, (batch, seq, hidden), dtype=jnp.float32)
    gamma = jnp.ones((hidden,), dtype=jnp.float32)
    beta = jnp.zeros((hidden,), dtype=jnp.float32)

    out = jax.block_until_ready(add_norm(x, y, gamma, beta))
    ref = add_norm_ref(x, y, gamma, beta)
    assert out.shape == (batch, seq, hidden)
    assert jnp.allclose(out, ref, atol=1e-4, rtol=1e-4), \
        float(jnp.max(jnp.abs(out - ref)))

    # Case 2: lane-dense hidden (multiple of 128) + ragged row count
    # -> row-wise kernel, MXU reductions, masked edge block (no wrapper pad).
    b2, s2, h2 = 2, 5, 256
    x2 = jax.random.normal(k3, (b2, s2, h2), dtype=jnp.float32)
    y2 = jax.random.normal(k4, (b2, s2, h2), dtype=jnp.float32)
    g2 = jnp.full((h2,), 0.5, dtype=jnp.float32)
    bt2 = jnp.full((h2,), -0.25, dtype=jnp.float32)

    out2 = jax.block_until_ready(add_norm(x2, y2, g2, bt2))
    ref2 = add_norm_ref(x2, y2, g2, bt2)
    assert out2.shape == (b2, s2, h2)
    assert jnp.allclose(out2, ref2, atol=1e-4, rtol=1e-4), \
        float(jnp.max(jnp.abs(out2 - ref2)))

    # Case 3: packed path with rows not divisible by k (tiny k-pad + slice)
    # and a partial final block.
    b3, s3, h3 = 1, 5, 32
    x3 = jax.random.normal(k5, (b3, s3, h3), dtype=jnp.float32)
    y3 = jax.random.normal(k6, (b3, s3, h3), dtype=jnp.float32)
    g3 = jnp.full((h3,), 1.5, dtype=jnp.float32)
    bt3 = jnp.full((h3,), 0.1, dtype=jnp.float32)

    out3 = jax.block_until_ready(add_norm(x3, y3, g3, bt3))
    ref3 = add_norm_ref(x3, y3, g3, bt3)
    assert out3.shape == (b3, s3, h3)
    assert jnp.allclose(out3, ref3, atol=1e-4, rtol=1e-4), \
        float(jnp.max(jnp.abs(out3 - ref3)))

    print("KERNEL_OK")
</pallas_src>

<mosaic_0001>
module attributes {stable_mosaic.version = 11 : i64} {
  func.func @_addnorm_packed_kernel(%arg0: i32, %arg1: memref<4x128xf32, #tpu.memory_space<vmem>>, %arg2: memref<4x128xf32, #tpu.memory_space<vmem>>, %arg3: memref<1x128xf32, #tpu.memory_space<vmem>>, %arg4: memref<1x128xf32, #tpu.memory_space<vmem>>, %arg5: memref<128x128xf32, #tpu.memory_space<vmem>>, %arg6: memref<4x128xf32, #tpu.memory_space<vmem>>) attributes {dimension_semantics = [#tpu.dimension_semantics<parallel>], iteration_bounds = array<i64: 1>, scalar_prefetch = 0 : i64, scratch_operands = 0 : i64, tpu.core_type = #tpu.core_type<tc>, window_params = [{transform_indices = @transform_0, window_bounds = array<i64: 4, 128>}, {transform_indices = @transform_1, window_bounds = array<i64: 4, 128>}, {pipeline_mode = #tpu.pipeline_mode<synchronous>, transform_indices = @transform_2, window_bounds = array<i64: 1, 128>}, {pipeline_mode = #tpu.pipeline_mode<synchronous>, transform_indices = @transform_3, window_bounds = array<i64: 1, 128>}, {pipeline_mode = #tpu.pipeline_mode<synchronous>, transform_indices = @transform_4, window_bounds = array<i64: 128, 128>}, {transform_indices = @transform_5, window_bounds = array<i64: 4, 128>}]} {
    %c0 = arith.constant 0 : index
    %c0_0 = arith.constant 0 : index
    %0 = vector.load %arg1[%c0, %c0_0] : memref<4x128xf32, #tpu.memory_space<vmem>>, vector<4x128xf32>
    %c0_1 = arith.constant 0 : index
    %c0_2 = arith.constant 0 : index
    %1 = vector.load %arg2[%c0_1, %c0_2] : memref<4x128xf32, #tpu.memory_space<vmem>>, vector<4x128xf32>
    %2 = arith.addf %0, %1 : vector<4x128xf32>
    %c0_3 = arith.constant 0 : index
    %c0_4 = arith.constant 0 : index
    %3 = vector.load %arg5[%c0_3, %c0_4] : memref<128x128xf32, #tpu.memory_space<vmem>>, vector<128x128xf32>
    %cst = arith.constant dense<0.000000e+00> : vector<4x128xf32>
    %4 = tpu.matmul %2, %3, %cst {dimension_numbers = #tpu.dot_dimension_numbers<[1], [0], [0], [1], [0, 0, 1, 1], [], []>, precision = #tpu.contract_precision<fp32>} : vector<4x128xf32>, vector<128x128xf32>, vector<4x128xf32> -> vector<4x128xf32>
    %cst_5 = arith.constant 3.125000e-02 : f32
    %5 = vector.broadcast %cst_5 : f32 to vector<4x128xf32>
    %6 = arith.mulf %4, %5 : vector<4x128xf32>
    %7 = arith.subf %2, %6 : vector<4x128xf32>
    %8 = arith.mulf %7, %7 : vector<4x128xf32>
    %cst_6 = arith.constant dense<0.000000e+00> : vector<4x128xf32>
    %9 = tpu.matmul %8, %3, %cst_6 {dimension_numbers = #tpu.dot_dimension_numbers<[1], [0], [0], [1], [0, 0, 1, 1], [], []>, precision = #tpu.contract_precision<fp32>} : vector<4x128xf32>, vector<128x128xf32>, vector<4x128xf32> -> vector<4x128xf32>
    %cst_7 = arith.constant 3.125000e-02 : f32
    %10 = vector.broadcast %cst_7 : f32 to vector<4x128xf32>
    %11 = arith.mulf %9, %10 : vector<4x128xf32>
    %cst_8 = arith.constant 9.99999974E-6 : f32
    %12 = vector.broadcast %cst_8 : f32 to vector<4x128xf32>
    %13 = arith.addf %11, %12 : vector<4x128xf32>
    %14 = math.rsqrt %13 : vector<4x128xf32>
    %15 = arith.mulf %7, %14 : vector<4x128xf32>
    %c0_9 = arith.constant 0 : index
    %c0_10 = arith.constant 0 : index
    %16 = vector.load %arg3[%c0_9, %c0_10] : memref<1x128xf32, #tpu.memory_space<vmem>>, vector<1x128xf32>
    %17 = vector.broadcast %16 : vector<1x128xf32> to vector<4x128xf32>
    %18 = arith.mulf %15, %17 : vector<4x128xf32>
    %c0_11 = arith.constant 0 : index
    %c0_12 = arith.constant 0 : index
    %19 = vector.load %arg4[%c0_11, %c0_12] : memref<1x128xf32, #tpu.memory_space<vmem>>, vector<1x128xf32>
    %20 = vector.broadcast %19 : vector<1x128xf32> to vector<4x128xf32>
    %21 = arith.addf %18, %20 : vector<4x128xf32>
    %c0_13 = arith.constant 0 : index
    %c0_14 = arith.constant 0 : index
    %22 = vector.load %arg6[%c0_13, %c0_14] : memref<4x128xf32, #tpu.memory_space<vmem>>, vector<4x128xf32>
    tpu.vector_store %arg6[%c0_13, %c0_14], %21 {strides = array<i32>} : memref<4x128xf32, #tpu.memory_space<vmem>>, vector<4x128xf32>,
    return
  }
  func.func @transform_0(%arg0: i32) -> (i32, i32) {
    %c0_i32 = arith.constant 0 : i32
    %c0_i32_0 = arith.constant 0 : i32
    return %arg0, %c0_i32 : i32, i32
  }
  func.func @transform_1(%arg0: i32) -> (i32, i32) {
    %c0_i32 = arith.constant 0 : i32
    %c0_i32_0 = arith.constant 0 : i32
    return %arg0, %c0_i32 : i32, i32
  }
  func.func @transform_2(%arg0: i32) -> (i32, i32) {
    %c0_i32 = arith.constant 0 : i32
    %c0_i32_0 = arith.constant 0 : i32
    %c0_i32_1 = arith.constant 0 : i32
    return %c0_i32, %c0_i32_0 : i32, i32
  }
  func.func @transform_3(%arg0: i32) -> (i32, i32) {
    %c0_i32 = arith.constant 0 : i32
    %c0_i32_0 = arith.constant 0 : i32
    %c0_i32_1 = arith.constant 0 : i32
    return %c0_i32, %c0_i32_0 : i32, i32
  }
  func.func @transform_4(%arg0: i32) -> (i32, i32) {
    %c0_i32 = arith.constant 0 : i32
    %c0_i32_0 = arith.constant 0 : i32
    %c0_i32_1 = arith.constant 0 : i32
    return %c0_i32, %c0_i32_0 : i32, i32
  }
  func.func @transform_5(%arg0: i32) -> (i32, i32) {
    %c0_i32 = arith.constant 0 : i32
    %c0_i32_0 = arith.constant 0 : i32
    return %arg0, %c0_i32 : i32, i32
  }
}

</mosaic_0001>

<bundles_post_ra>
// kernel: tpu_custom_call.1
= control target key start
LH: loop header
LB: loop body
LE: loop exit
PB: predicated region body
PF: predicated region fallthrough
CT: control target
= control target key end

     0   :  { %10 = vsyncpa [#allocation3], 0  ;;  %s1371_s0 = inlined_call_operand.hbm [shape: f32[4,128], index: 0, kind: input, shape index: {}]   ;;  %s1372_s1 = inlined_call_operand.hbm [shape: f32[4,128], index: 1, kind: input, shape index: {}]   ;;  %s1373_s2 = inlined_call_operand.vmem [shape: f32[1,128], index: 2, kind: input, shape index: {}]   ;;  %s1374_s3 = inlined_call_operand.vmem [shape: f32[1,128], index: 3, kind: input, shape index: {}]   ;;  %s1375_s4 = inlined_call_operand.hbm [shape: f32[128,128], index: 4, kind: input, shape index: {}]   ;;  %s1376_s5 = inlined_call_operand.hbm [shape: f32[4,128], index: 5, kind: output, shape index: {}]  }
   0x1   :  { %11 = vsyncpa [#allocation6], 0  ;;  %s29_s20 = sshll.u32 %s1372_s1, 4  ;;  %s30_s20 = int_to_ptr.hbm [resolvable:$true] %s29_s20 }
   0x2   :  { %12 = vsyncpa [#allocation4], 0  ;;  %s922_s21 = smov [#allocation5]   ;;  %s18_s25 = sshll.u32 %s1371_s0, 4  ;;  %s19_s25 = int_to_ptr.hbm [resolvable:$true] %s18_s25 }
   0x3   :  { %s31_s22 = sshll.u32 %s922_s21, 4  ;;  %s923_s26 = smov [#allocation2]   ;;  %s32_s22 = int_to_ptr.vmem [resolvable:$true] %s31_s22 }
   0x4   :  { %34 = dma.hbm_to_vmem [thread:$0]  %s30_s20, 64, %s32_s22, [#allocation6]  }
   0x5   :  { %s20_s27 = sshll.u32 %s923_s26, 4  ;;  %s43_s30 = sshll.u32 %s1375_s4, 4  ;;  %s21_s27 = int_to_ptr.vmem [resolvable:$true] %s20_s27  ;;  %s44_s30 = int_to_ptr.hbm [resolvable:$true] %s43_s30 }
   0x6   :  { %23 = dma.hbm_to_vmem [thread:$0]  %s19_s25, 64, %s21_s27, [#allocation3]  }
   0x7   :  { %s924_s1 = smov [#allocation7]   ;;  %s925_s7 = smov 128  }
   0x8   :  { %s45_s6 = sshll.u32 %s924_s1, 4  ;;  %s926_s8 = smov 8   ;;  %s46_s6 = int_to_ptr.vmem [resolvable:$true] %s45_s6 }
   0x9   :  { %51 = dma.hbm_to_vmem [thread:$0]  %s44_s30, 2048, %s46_s6, [#allocation6], %s925_s7, %s925_s7, %s926_s8  }
   0xa   :  { %916 = dma.done.wait [#allocation3], 64  }
   0xb   :  { %917 = vsyncadd [#allocation3], 4294967232 }
   0xc   :  { %918 = dma.done.wait [#allocation6], 2112  }
   0xd   :  { %919 = vsyncadd [#allocation6], 4294965184  ;;  %v82_v0 = vld [vmem:[#allocation7 + $0x78] sm:$0xff]  ;;  %v81_v1 = vld [vmem:[#allocation7 + $0x70] sm:$0xff]  ;;  %s927_s11 = smov [#allocation8]   ;;  %s799_s15 = sshll.u32 %s1376_s5, 4  ;;  %s800_s15 = int_to_ptr.hbm [resolvable:$true] %s799_s15 }
   0xe   :  { %v80_v2 = vld [vmem:[#allocation7 + $0x68] sm:$0xff]  ;;  %v967_v3 = vand.u32 4294901760, %v82_v0  ;;  %v969_v4 = vand.u32 4294901760, %v81_v1  ;;  %v79_v6 = vld [vmem:[#allocation7 + $0x60] sm:$0xff]  ;;  %v78_v7 = vld [vmem:[#allocation7 + $0x58] sm:$0xff]  ;;  %s797_s12 = sshll.u32 %s927_s11, 4  ;;  %s798_s12 = int_to_ptr.vmem [resolvable:$true] %s797_s12 }
   0xf   :  { %v971_v5 = vand.u32 4294901760, %v80_v2  ;;  %v77_v8 = vld [vmem:[#allocation7 + $0x50] sm:$0xff]  ;;  %v973_v9 = vand.u32 4294901760, %v79_v6  ;;  %v975_v10 = vand.u32 4294901760, %v78_v7  ;;  %v76_v12 = vld [vmem:[#allocation7 + $0x48] sm:$0xff]  ;;  %v75_v13 = vld [vmem:[#allocation7 + $0x40] sm:$0xff] }
  0x10   :  { %v977_v11 = vand.u32 4294901760, %v77_v8  ;;  %84 = vmatpush.msra.mxu0 %v967_v3  ;;  %v981_v14 = vsub.f32 %v82_v0, %v967_v3  ;;  %v984_v15 = vsub.f32 %v81_v1, %v969_v4  ;;  %v989_v17 = vand.u32 4294901760, %v76_v12  ;;  %v74_v18 = vld [vmem:[#allocation7 + $0x38] sm:$0xff]  ;;  %280 = vmatpush.msra.mxu3 %v967_v3  ;;  %v73_v26 = vld [vmem:[#allocation7 + $0x30] sm:$0xff]  ;;  %v72_v36 = vld [vmem:[#allocation7 + $0x28] sm:$0xff] }
  0x11   :  { %v987_v16 = vsub.f32 %v80_v2, %v971_v5  ;;  %v993_v19 = vsub.f32 %v79_v6, %v973_v9  ;;  %v996_v20 = vsub.f32 %v78_v7, %v975_v10  ;;  %v1011_v25 = vand.u32 4294901760, %v75_v13  ;;  %v71_v42 = vld [vmem:[#allocation7 + $0x20] sm:$0xff]  ;;  %v70_v47 = vld [vmem:[#allocation7 + $0x18] sm:$0xff]  ;;  %v69_v55 = vld [vmem:[#allocation7 + $0x10] sm:$0xff] }
  0x12   :  { %v999_v21 = vsub.f32 %v77_v8, %v977_v11  ;;  %86 = vmatpush.msra.mxu0 %v969_v4  ;;  %v1003_v22 = vand.u32 4294901760, %v981_v14  ;;  %v1006_v23 = vand.u32 4294901760, %v984_v15  ;;  %227 = vmatpush.msra.mxu2 %v981_v14  ;;  %v1017_v28 = vand.u32 4294901760, %v74_v18  ;;  %v68_v60 = vld [vmem:[#allocation7 + $0x8] sm:$0xff]  ;;  %v64_v61 = vld [vmem:[#allocation2] sm:$0xf] }
  0x13   :  { %v1009_v24 = vand.u32 4294901760, %v987_v16  ;;  %v1015_v27 = vand.u32 4294901760, %v993_v19  ;;  %v1020_v29 = vsub.f32 %v76_v12, %v989_v17  ;;  %282 = vmatpush.msra.mxu3 %v969_v4  ;;  %v1031_v33 = vand.u32 4294901760, %v996_v20  ;;  %v65_v62 = vld [vmem:[#allocation5] sm:$0xf]  ;;  %v67_v6 = vld [vmem:[#allocation7] sm:$0xff] }
  0x14   :  { %88 = vmatpush.msra.mxu0 %v971_v5  ;;  %v127_v30 = vsub.f32 %v981_v14, %v1003_v22  ;;  %v133_v31 = vsub.f32 %v984_v15, %v1006_v23  ;;  %230 = vmatpush.msra.mxu2 %v984_v15  ;;  %v1035_v34 = vand.u32 4294901760, %v999_v21  ;;  %v1037_v35 = vand.u32 4294901760, %v73_v26 }
  0x15   :  { %v139_v32 = vsub.f32 %v987_v16, %v1009_v24  ;;  %284 = vmatpush.msra.mxu3 %v971_v5  ;;  %v145_v39 = vsub.f32 %v993_v19, %v1015_v27  ;;  %v1048_v40 = vsub.f32 %v75_v13, %v1011_v25  ;;  %v1052_v41 = vand.u32 4294901760, %v1020_v29 }
  0x16   :  { %v1040_v37 = vand.u32 4294901760, %v127_v30  ;;  %90 = vmatpush.msra.mxu0 %v973_v9  ;;  %v1043_v38 = vand.u32 4294901760, %v133_v31  ;;  %233 = vmatpush.msra.mxu2 %v987_v16  ;;  %v151_v44 = vsub.f32 %v996_v20, %v1031_v33  ;;  %v1061_v45 = vand.u32 4294901760, %v72_v36 }
  0x17   :  { %1385 = vst [vmem:[#allocation12_spill] sm:$0xff] %v1048_v40  ;;  %286 = vmatpush.msra.mxu3 %v973_v9  ;;  %v1057_v43 = vand.u32 4294901760, %v139_v32  ;;  %v1064_v46 = vsub.f32 %v74_v18, %v1017_v28  ;;  %v1067_v48 = vand.u32 4294901760, %v1048_v40  ;;  %v1073_v49 = vand.u32 4294901760, %v145_v39 }
  0x18   :  { %129 = vmatpush.msra.mxu1 %v1040_v37  ;;  %92 = vmatpush.msra.mxu0 %v975_v10  ;;  %v157_v50 = vsub.f32 %v999_v21, %v1035_v34  ;;  %v1077_v51 = vand.u32 4294901760, %v71_v42  ;;  %v1080_v52 = vsub.f32 %v73_v26, %v1037_v35  ;;  %v163_v53 = vsub.f32 %v1020_v29, %v1052_v41 }
  0x19   :  { %1386 = vst [vmem:[#allocation13_spill] sm:$0xff] %v1064_v46  ;;  %236 = vmatpush.msra.mxu2 %v993_v19  ;;  %288 = vmatpush.msra.mxu3 %v975_v10  ;;  %v1084_v54 = vand.u32 4294901760, %v70_v47  ;;  %v1090_v56 = vand.u32 4294901760, %v151_v44  ;;  %v1093_v57 = vand.u32 4294901760, %v1064_v46  ;;  %v1096_v58 = vsub.f32 %v72_v36, %v1061_v45 }
  0x1a   :  { %135 = vmatpush.msra.mxu1 %v1043_v38  ;;  %94 = vmatpush.msra.mxu0 %v977_v11  ;;  %1387 = vst [vmem:[#allocation14_spill] sm:$0xff] %v1080_v52  ;;  %v169_v59 = vsub.f32 %v1048_v40, %v1067_v48  ;;  %v1104_v63 = vand.u32 4294901760, %v157_v50  ;;  %v1107_v0 = vand.u32 4294901760, %v1080_v52  ;;  %v1109_v1 = vand.u32 4294901760, %v69_v55 }
  0x1b   :  { %239 = vmatpush.msra.mxu2 %v996_v20  ;;  %290 = vmatpush.msra.mxu3 %v977_v11  ;;  %1388 = vst [vmem:[#allocation15_spill] sm:$0xff] %v1096_v58  ;;  %v1112_v2 = vsub.f32 %v71_v42, %v1077_v51  ;;  %v1114_v7 = vand.u32 4294901760, %v163_v53  ;;  %v1117_v8 = vsub.f32 %v70_v47, %v1084_v54  ;;  %v1126_v13 = vand.u32 4294901760, %v1096_v58 }
  0x1c   :  { %141 = vmatpush.msra.mxu1 %v1057_v43  ;;  %96 = vmatpush.msra.mxu0 %v989_v17  ;;  %v175_v12 = vsub.f32 %v1064_v46, %v1093_v57  ;;  %v1128_v18 = vand.u32 4294901760, %v68_v60  ;;  %v1130_v26 = vadd.f32 %v65_v62, %v64_v61  ;;  %v1132_v30 = vand.u32 4294901760, %v169_v59 }
  0x1d   :  { %242 = vmatpush.msra.mxu2 %v999_v21  ;;  %292 = vmatpush.msra.mxu3 %v989_v17  ;;  %1389 = vst [vmem:[#allocation16_spill] sm:$0xff] %v1112_v2  ;;  %v1134_v31 = vand.u32 4294901760, %v67_v6  ;;  %v181_v32 = vsub.f32 %v1080_v52, %v1107_v0  ;;  %v1143_v36 = vand.u32 4294901760, %v1112_v2  ;;  %v1146_v39 = vsub.f32 %v69_v55, %v1109_v1 }
  0x1e   :  { %147 = vmatpush.msra.mxu1 %v1073_v49  ;;  %98 = vmatpush.msra.mxu0 %v1011_v25  ;;  %1390 = vst [vmem:[#allocation17_spill] sm:$0xff] %v1117_v8  ;;  %v1149_v42 = vand.u32 4294901760, %v1130_v26  ;;  %v1152_v44 = vand.u32 4294901760, %v1117_v8  ;;  %v1158_v47 = vand.u32 4294901760, %v175_v12  ;;  %v187_v50 = vsub.f32 %v1096_v58, %v1126_v13 }
  0x1f   :  { %245 = vmatpush.msra.mxu2 %v1020_v29  ;;  %294 = vmatpush.msra.mxu3 %v1011_v25  ;;  %1391 = vst [vmem:[#allocation18_spill] sm:$0xff] %v1130_v26  ;;  %v1163_v53 = vsub.f32 %v68_v60, %v1128_v18  ;;  %v1171_v59 = vand.u32 4294901760, %v181_v32  ;;  %v193_v61 = vsub.f32 %v1112_v2, %v1143_v36  ;;  %v1176_v62 = vand.u32 4294901760, %v1146_v39 }
  0x20   :  { %153 = vmatpush.msra.mxu1 %v1090_v56  ;;  %100 = vmatpush.msra.mxu0 %v1017_v28  ;;  %1392 = vst [vmem:[#allocation19_spill] sm:$0xff] %v1146_v39  ;;  %v116_v55 = vsub.f32 %v1130_v26, %v1149_v42  ;;  %v1179_v60 = vsub.f32 %v67_v6, %v1134_v31  ;;  %v1185_v12 = vand.u32 4294901760, %v187_v50 }
  0x21   :  { %248 = vmatpush.msra.mxu2 %v1048_v40  ;;  %296 = vmatpush.msra.mxu3 %v1017_v28  ;;  %v199_v32 = vsub.f32 %v1117_v8, %v1152_v44  ;;  %v1190_v26 = vand.u32 4294901760, %v1163_v53  ;;  %v1196_v6 = vand.u32 4294901760, %v193_v61  ;;  %v205_v50 = vsub.f32 %v1146_v39, %v1176_v62 }
  0x22   :  { %159 = vmatpush.msra.mxu1 %v1104_v63  ;;  %102 = vmatpush.msra.mxu0 %v1037_v35 }
  0x23   :  { %251 = vmatpush.msra.mxu2 %v1064_v46  ;;  %298 = vmatpush.msra.mxu3 %v1037_v35  ;;  %v211_v61 = vsub.f32 %v1163_v53, %v1190_v26 }
  0x24   :  { %165 = vmatpush.msra.mxu1 %v1114_v7  ;;  %104 = vmatpush.msra.mxu0 %v1061_v45 }
  0x25   :  { %254 = vmatpush.msra.mxu2 %v1080_v52  ;;  %300 = vmatpush.msra.mxu3 %v1061_v45  ;;  %v117_v52 = vand.u32 4294901760, %v116_v55 }
  0x26   :  { %171 = vmatpush.msra.mxu1 %v1132_v30  ;;  %106 = vmatpush.msra.mxu0 %v1077_v51 }
  0x27   :  { %257 = vmatpush.msra.mxu2 %v1096_v58  ;;  %302 = vmatpush.msra.mxu3 %v1077_v51  ;;  %v1201_v58 = vand.u32 4294901760, %v1179_v60  ;;  %v118_v46 = vsub.f32 %v116_v55, %v117_v52 }
  0x28   :  { %177 = vmatpush.msra.mxu1 %v1158_v47  ;;  %108 = vmatpush.msra.mxu0 %v1084_v54 }
  0x29   :  { %260 = vmatpush.msra.mxu2 %v1112_v2  ;;  %304 = vmatpush.msra.mxu3 %v1084_v54  ;;  %v1207_v2 = vand.u32 4294901760, %v199_v32  ;;  %v217_v40 = vsub.f32 %v1179_v60, %v1201_v58  ;;  %v1222_v32 = vand.u32 4294901760, %v211_v61 }
  0x2a   :  { %183 = vmatpush.msra.mxu1 %v1171_v59  ;;  %110 = vmatpush.msra.mxu0 %v1109_v1 }
  0x2b   :  { %263 = vmatpush.msra.mxu2 %v1117_v8  ;;  %306 = vmatpush.msra.mxu3 %v1109_v1  ;;  %v1215_v8 = vand.u32 4294901760, %v205_v50  ;;  %v1228_v50 = vand.u32 4294901760, %v217_v40 }
  0x2c   :  { %189 = vmatpush.msra.mxu1 %v1185_v12  ;;  %112 = vmatpush.msra.mxu0 %v1128_v18 }
  0x2d   :  { %266 = vmatpush.msra.mxu2 %v1146_v39  ;;  %308 = vmatpush.msra.mxu3 %v1128_v18  ;;  %v119_v39 = vand.u32 4294901760, %v118_v46 }
  0x2e   :  { %195 = vmatpush.msra.mxu1 %v1196_v6  ;;  %114 = vmatpush.msra.mxu0 %v1134_v31 }
  0x2f   :  { %269 = vmatpush.msra.mxu2 %v1163_v53  ;;  %310 = vmatpush.msra.mxu3 %v1134_v31 }
  0x30   :  { %321 = vmatpush.msrb.mxu0 %v1003_v22  ;;  %201 = vmatpush.msra.mxu1 %v1207_v2 }
  0x31   :  { %272 = vmatpush.msra.mxu2 %v1179_v60  ;;  %314 = vmatmul.f32.vlgmr.msra.gmra.mxu3 %v117_v52 }
  0x32   :  { %325 = vmatpush.msrb.mxu0 %v1006_v23  ;;  %207 = vmatpush.msra.mxu1 %v1215_v8 }
  0x33   :  { %275 = vmatmul.f32.vlgmr.msra.gmra.mxu2 %v116_v55  ;;  %120 = vmatmul.f32.vlgmr.msra.gmra.mxu0 %v119_v39 }
  0x34   :  { %329 = vmatpush.msrb.mxu0 %v1009_v24  ;;  %213 = vmatpush.msra.mxu1 %v1222_v32 }
  0x35   :  { %473 = vmatpush.msrb.mxu3 %v1040_v37  ;;  %428 = vmatpush.msrb.mxu2 %v967_v3 }
  0x36   :  { %333 = vmatpush.msrb.mxu0 %v1015_v27  ;;  %219 = vmatpush.msra.mxu1 %v1228_v50 }
  0x37   :  { %221 = vmatmul.f32.vlgmr.msra.gmra.mxu1 %v1149_v42  ;;  %479 = vmatpush.msrb.mxu3 %v1043_v38 }
  0x38   :  { %388 = vmatpush.msrb.mxu1 %v967_v3  ;;  %337 = vmatpush.msrb.mxu0 %v1031_v33 }
  0x39   :  { %485 = vmatpush.msrb.mxu3 %v1057_v43  ;;  %430 = vmatpush.msrb.mxu2 %v969_v4 }
  0x3a   :  { %390 = vmatpush.msrb.mxu1 %v969_v4  ;;  %341 = vmatpush.msrb.mxu0 %v1035_v34 }
  0x3b   :  { %491 = vmatpush.msrb.mxu3 %v1073_v49  ;;  %432 = vmatpush.msrb.mxu2 %v971_v5 }
  0x3c   :  { %392 = vmatpush.msrb.mxu1 %v971_v5  ;;  %345 = vmatpush.msrb.mxu0 %v1052_v41 }
  0x3d   :  { %497 = vmatpush.msrb.mxu3 %v1090_v56  ;;  %434 = vmatpush.msrb.mxu2 %v973_v9 }
  0x3e   :  { %394 = vmatpush.msrb.mxu1 %v973_v9  ;;  %349 = vmatpush.msrb.mxu0 %v1067_v48 }
  0x3f   :  { %503 = vmatpush.msrb.mxu3 %v1104_v63  ;;  %436 = vmatpush.msrb.mxu2 %v975_v10 }
  0x40   :  { %396 = vmatpush.msrb.mxu1 %v975_v10  ;;  %353 = vmatpush.msrb.mxu0 %v1093_v57 }
  0x41   :  { %509 = vmatpush.msrb.mxu3 %v1114_v7  ;;  %438 = vmatpush.msrb.mxu2 %v977_v11 }
  0x42   :  { %398 = vmatpush.msrb.mxu1 %v977_v11  ;;  %357 = vmatpush.msrb.mxu0 %v1107_v0 }
  0x43   :  { %515 = vmatpush.msrb.mxu3 %v1132_v30  ;;  %440 = vmatpush.msrb.mxu2 %v989_v17 }
  0x44   :  { %400 = vmatpush.msrb.mxu1 %v989_v17  ;;  %361 = vmatpush.msrb.mxu0 %v1126_v13 }
  0x45   :  { %521 = vmatpush.msrb.mxu3 %v1158_v47  ;;  %442 = vmatpush.msrb.mxu2 %v1011_v25 }
  0x46   :  { %402 = vmatpush.msrb.mxu1 %v1011_v25  ;;  %365 = vmatpush.msrb.mxu0 %v1143_v36 }
  0x47   :  { %527 = vmatpush.msrb.mxu3 %v1171_v59  ;;  %444 = vmatpush.msrb.mxu2 %v1017_v28 }
  0x48   :  { %404 = vmatpush.msrb.mxu1 %v1017_v28  ;;  %369 = vmatpush.msrb.mxu0 %v1152_v44 }
  0x49   :  { %533 = vmatpush.msrb.mxu3 %v1185_v12  ;;  %446 = vmatpush.msrb.mxu2 %v1037_v35 }
  0x4a   :  { %406 = vmatpush.msrb.mxu1 %v1037_v35  ;;  %373 = vmatpush.msrb.mxu0 %v1176_v62 }
  0x4b   :  { %539 = vmatpush.msrb.mxu3 %v1196_v6  ;;  %448 = vmatpush.msrb.mxu2 %v1061_v45 }
  0x4c   :  { %408 = vmatpush.msrb.mxu1 %v1061_v45  ;;  %377 = vmatpush.msrb.mxu0 %v1190_v26 }
  0x4d   :  { %545 = vmatpush.msrb.mxu3 %v1207_v2  ;;  %450 = vmatpush.msrb.mxu2 %v1077_v51 }
  0x4e   :  { %410 = vmatpush.msrb.mxu1 %v1077_v51  ;;  %381 = vmatpush.msrb.mxu0 %v1201_v58 }
  0x4f   :  { %383 = vmatmul.f32.vlgmr.msrb.gmra.mxu0 %v1149_v42  ;;  %551 = vmatpush.msrb.mxu3 %v1215_v8 }
  0x50   :  { %412 = vmatpush.msrb.mxu1 %v1084_v54  ;;  %571 = vmatpush.msra.mxu0 %v981_v14  ;;  %v1399_v14 = vld [vmem:[#allocation19_spill] sm:$0xff] }
  0x51   :  { %557 = vmatpush.msrb.mxu3 %v1222_v32  ;;  %452 = vmatpush.msrb.mxu2 %v1084_v54 }
  0x52   :  { %414 = vmatpush.msrb.mxu1 %v1109_v1  ;;  %574 = vmatpush.msra.mxu0 %v984_v15 }
  0x53   :  { %563 = vmatpush.msrb.mxu3 %v1228_v50  ;;  %454 = vmatpush.msrb.mxu2 %v1109_v1 }
  0x54   :  { %416 = vmatpush.msrb.mxu1 %v1128_v18  ;;  %577 = vmatpush.msra.mxu0 %v987_v16 }
  0x55   :  { %732 = vmatpush.msra.mxu3 %v967_v3  ;;  %456 = vmatpush.msrb.mxu2 %v1128_v18 }
  0x56   :  { %418 = vmatpush.msrb.mxu1 %v1134_v31  ;;  %580 = vmatpush.msra.mxu0 %v993_v19 }
  0x57   :  { %420 = vmatmul.f32.vlgmr.msrb.gmra.mxu1 %v1149_v42  ;;  %734 = vmatpush.msra.mxu3 %v969_v4 }
  0x58   :  { %624 = vmatpush.msra.mxu1 %v967_v3  ;;  %583 = vmatpush.msra.mxu0 %v996_v20  ;;  %v1393_v3 = vld [vmem:[#allocation12_spill] sm:$0xff] }
  0x59   :  { %736 = vmatpush.msra.mxu3 %v971_v5  ;;  %458 = vmatpush.msrb.mxu2 %v1134_v31 }
  0x5a   :  { %626 = vmatpush.msra.mxu1 %v969_v4  ;;  %586 = vmatpush.msra.mxu0 %v999_v21  ;;  %v1394_v4 = vld [vmem:[#allocation13_spill] sm:$0xff] }
  0x5b   :  { %738 = vmatpush.msra.mxu3 %v973_v9  ;;  %665 = vmatpush.msra.mxu2 %v1003_v22 }
  0x5c   :  { %628 = vmatpush.msra.mxu1 %v971_v5  ;;  %589 = vmatpush.msra.mxu0 %v1020_v29  ;;  %v1395_v5 = vld [vmem:[#allocation14_spill] sm:$0xff] }
  0x5d   :  { %740 = vmatpush.msra.mxu3 %v975_v10  ;;  %669 = vmatpush.msra.mxu2 %v1006_v23  ;;  %v1400_v29 = vld [vmem:[#allocation18_spill] sm:$0xff] }
  0x5e   :  { %630 = vmatpush.msra.mxu1 %v973_v9  ;;  %592 = vmatpush.msra.mxu0 %v1393_v3  ;;  %v1396_v9 = vld [vmem:[#allocation15_spill] sm:$0xff] }
  0x5f   :  { %742 = vmatpush.msra.mxu3 %v977_v11  ;;  %673 = vmatpush.msra.mxu2 %v1009_v24 }
  0x60   :  { %632 = vmatpush.msra.mxu1 %v975_v10  ;;  %595 = vmatpush.msra.mxu0 %v1394_v4  ;;  %v1397_v10 = vld [vmem:[#allocation16_spill] sm:$0xff] }
  0x61   :  { %744 = vmatpush.msra.mxu3 %v989_v17  ;;  %677 = vmatpush.msra.mxu2 %v1015_v27 }
  0x62   :  { %634 = vmatpush.msra.mxu1 %v977_v11  ;;  %598 = vmatpush.msra.mxu0 %v1395_v5  ;;  %v1398_v11 = vld [vmem:[#allocation17_spill] sm:$0xff] }
  0x63   :  { %746 = vmatpush.msra.mxu3 %v1011_v25  ;;  %681 = vmatpush.msra.mxu2 %v1031_v33 }
  0x64   :  { %636 = vmatpush.msra.mxu1 %v989_v17  ;;  %601 = vmatpush.msra.mxu0 %v1396_v9 }
  0x65   :  { %748 = vmatpush.msra.mxu3 %v1017_v28  ;;  %685 = vmatpush.msra.mxu2 %v1035_v34 }
  0x66   :  { %638 = vmatpush.msra.mxu1 %v1011_v25  ;;  %604 = vmatpush.msra.mxu0 %v1397_v10 }
  0x67   :  { %750 = vmatpush.msra.mxu3 %v1037_v35  ;;  %689 = vmatpush.msra.mxu2 %v1052_v41 }
  0x68   :  { %640 = vmatpush.msra.mxu1 %v1017_v28  ;;  %607 = vmatpush.msra.mxu0 %v1398_v11 }
  0x69   :  { %752 = vmatpush.msra.mxu3 %v1061_v45  ;;  %693 = vmatpush.msra.mxu2 %v1067_v48 }
  0x6a   :  { %642 = vmatpush.msra.mxu1 %v1037_v35  ;;  %610 = vmatpush.msra.mxu0 %v1399_v14 }
  0x6b   :  { %754 = vmatpush.msra.mxu3 %v1077_v51  ;;  %697 = vmatpush.msra.mxu2 %v1093_v57 }
  0x6c   :  { %644 = vmatpush.msra.mxu1 %v1061_v45  ;;  %613 = vmatpush.msra.mxu0 %v1163_v53 }
  0x6d   :  { %756 = vmatpush.msra.mxu3 %v1084_v54  ;;  %701 = vmatpush.msra.mxu2 %v1107_v0 }
  0x6e   :  { %646 = vmatpush.msra.mxu1 %v1077_v51  ;;  %616 = vmatpush.msra.mxu0 %v1179_v60 }
  0x6f   :  { %758 = vmatpush.msra.mxu3 %v1109_v1  ;;  %705 = vmatpush.msra.mxu2 %v1126_v13 }
  0x70   :  { %648 = vmatpush.msra.mxu1 %v1084_v54 }
  0x71   :  { %760 = vmatpush.msra.mxu3 %v1128_v18  ;;  %709 = vmatpush.msra.mxu2 %v1143_v36  ;;  %v817_v36 = vld [vmem:[%s1374_s3] ss:$0 sm:$0xff] }
  0x72   :  { %650 = vmatpush.msra.mxu1 %v1109_v1 }
  0x73   :  { %762 = vmatpush.msra.mxu3 %v1134_v31  ;;  %713 = vmatpush.msra.mxu2 %v1152_v44 }
  0x74   :  { %652 = vmatpush.msra.mxu1 %v1128_v18 }
  0x75   :  { %717 = vmatpush.msra.mxu2 %v1176_v62 }
  0x76   :  { %654 = vmatpush.msra.mxu1 %v1134_v31 }
  0x77   :  { %721 = vmatpush.msra.mxu2 %v1190_v26  ;;  %v816_v26 = vld [vmem:[%s1373_s2] ss:$0 sm:$0xff] }
  0x79   :  { %725 = vmatpush.msra.mxu2 %v1201_v58 }
  0xb0   :  { %v121_v16 = vpop.f32.mrf.mxu0 }
  0xb4   :  { %v222_v15 = vpop.f32.mrf.mxu1  ;;  %v315_v21 = vpop.f32.mrf.mxu3 }
  0xb5   :  { %v223_v17 = vadd.f32 %v222_v15, %v121_v16 }
  0xb6   :  { %v276_v19 = vpop.f32.mrf.mxu2 }
  0xb7   :  { %v277_v20 = vadd.f32 %v276_v19, %v223_v17 }
  0xb9   :  { %v316_v22 = vadd.f32 %v315_v21, %v277_v20 }
  0xcc   :  { %v384_v23 = vpop.f32.mrf.mxu0 }
  0xcd   :  { %v385_v24 = vadd.f32 %v384_v23, %v316_v22 }
  0xd4   :  { %v421_v25 = vpop.f32.mrf.mxu1 }
  0xd5   :  { %v422_v27 = vadd.f32 %v421_v25, %v385_v24 }
  0xd7   :  { %v424_v28 = vmul.f32 0.03125, %v422_v27 }
  0xd9   :  { %v425_v33 = vsub.f32 %v1400_v29, %v424_v28 }
  0xdb   :  { %v426_v34 = vmul.f32 %v425_v33, %v425_v33 }
  0xdd   :  { %v459_v35 = vand.u32 4294901760, %v426_v34 }
  0xdf   :  { %v460_v37 = vsub.f32 %v426_v34, %v459_v35  ;;  %565 = vmatmul.f32.vlgmr.msrb.gmra.mxu3 %v459_v35 }
  0xe1   :  { %619 = vmatmul.f32.vlgmr.msra.gmra.mxu0 %v460_v37  ;;  %v461_v38 = vand.u32 4294901760, %v460_v37 }
  0xe3   :  { %658 = vmatmul.f32.vlgmr.msra.gmra.mxu1 %v461_v38  ;;  %v462_v40 = vsub.f32 %v460_v37, %v461_v38 }
  0xe5   :  { %v463_v41 = vand.u32 4294901760, %v462_v40 }
  0xe7   :  { %464 = vmatmul.f32.vlgmr.msrb.gmra.mxu2 %v463_v41  ;;  %764 = vmatmul.f32.vlgmr.msra.gmra.mxu3 %v459_v35 }
  0xef   :  { %727 = vmatmul.f32.vlgmr.msra.gmra.mxu2 %v459_v35 }
 0x15e   :  { %v620_v48 = vpop.f32.mrf.mxu0 }
 0x160   :  { %v659_v51 = vpop.f32.mrf.mxu1 }
 0x162   :  { %v566_v43 = vpop.f32.mrf.mxu3 }
 0x16a   :  { %v465_v45 = vpop.f32.mrf.mxu2  ;;  %v765_v57 = vpop.f32.mrf.mxu3 }
 0x16b   :  { %v567_v46 = vadd.f32 %v566_v43, %v465_v45 }
 0x16d   :  { %v621_v49 = vadd.f32 %v620_v48, %v567_v46 }
 0x16f   :  { %v660_v52 = vadd.f32 %v659_v51, %v621_v49 }
 0x172   :  { %v728_v54 = vpop.f32.mrf.mxu2 }
 0x173   :  { %v729_v56 = vadd.f32 %v728_v54, %v660_v52 }
 0x175   :  { %v766_v58 = vadd.f32 %v765_v57, %v729_v56 }
 0x177   :  { %v768_v63 = vmul.f32 0.03125, %v766_v58 }
 0x179   :  { %v769_v0 = vadd.f32 1e-05, %v768_v63 }
 0x17b   :  { %818 = vrsqrt.f32 %v769_v0  ;;  %vm776_vm1 = vweird.f32 %v769_v0 }
 0x181   :  { %v819_v1 = vpop.eup %818 }
 0x182   :  { %v771_v2 = vmul.f32 %v819_v1, %v769_v0  ;;  %vm777_vm0 = vweird.f32 %v819_v1 }
 0x183   :  { %vm778_vm2 = vmor %vm776_vm1, %vm777_vm0 }
 0x184   :  { %v772_v7 = vmul.f32 %v819_v1, %v771_v2 }
 0x186   :  { %v773_v8 = vmul.f32 0.5, %v772_v7 }
 0x188   :  { %v774_v13 = vsub.f32 1.5, %v773_v8 }
 0x18a   :  { %v775_v18 = vmul.f32 %v819_v1, %v774_v13 }
 0x18c   :  { %v779_v30 = vsel %vm778_vm2, %v819_v1, %v775_v18 }
 0x18d   :  { %v780_v31 = vmul.f32 %v779_v30, %v425_v33 }
 0x18f   :  { %v785_v39 = vmul.f32 %v816_v26, %v780_v31 }
 0x191   :  { %v790_v42 = vadd.f32 %v817_v36, %v785_v39 }
 0x193   :  { %791 = vst [vmem:[#allocation8] sm:$0xf] %v790_v42 }
 0x194   :  { %802 = dma.vmem_to_hbm [thread:$0]  %s798_s12, 64, %s800_s15, [#allocation4]  }
 0x195   :  { %920 = dma.done.wait [#allocation4], 64  }
 0x196   :  { %921 = vsyncadd [#allocation4], 4294967232 }
 0x197   :  { %807 = vsyncpa [#allocation3], 1 }
 0x198   :  { %808 = vsyncpa [#allocation6], 1 }
 0x199   :  { %809 = vsyncpa [#allocation4], 1 }

</bundles_post_ra>
